<compile_context>
chip_gen: v5e
topology: v5e:2x2
jax: 0.10.0
libtpu: 0.0.40
codegen_flags: <defaults>
</compile_context>

<pallas_src>
import numpy as np
import jax
import jax.numpy as jnp
from jax.experimental import pallas as pl
from jax.experimental.pallas import tpu as pltpu

NUM_CLASSES = 5
SMOOTHING = 0.1
_MAX_TILE_B = 8192      # batch samples (lanes) per grid step; multiple of 128
_N_CORES = 2            # leading "parallel" axis (v7x megacore split)


def build_smooth_label_table(num_classes: int, smoothing: float) -> np.ndarray:
    """Row t = the smooth-label vector the PyTorch forward builds for true_class=t."""
    table = np.zeros((num_classes, num_classes), dtype=np.float32)
    for true_class in range(num_classes):
        table[true_class, true_class] = 1.0 - smoothing
        remaining_prob = smoothing
        for distance in range(1, num_classes):
            weight = max(0, 1.0 - distance * 0.3)
            for direction in (-1, 1):
                adj_class = true_class + direction * distance
                if 0 <= adj_class < num_classes:
                    prob = remaining_prob * weight / 2
                    table[true_class, adj_class] = prob
                    remaining_prob -= prob
            if remaining_prob <= 0:
                break
    return table


def _make_kernel(table_np, num_classes, batch, tile_b, tiles_per_core):
    C = num_classes

    def kernel(pred_ref, tgt_ref, out_ref, acc_ref):
        core = pl.program_id(0)
        j = pl.program_id(1)
        nj = pl.num_programs(1)

        @pl.when(j == 0)
        def _():
            acc_ref[...] = jnp.zeros_like(acc_ref)

        pred = pred_ref[...].astype(jnp.float32)      # (C, tile_b)
        tgt = tgt_ref[...]                            # (1, tile_b) int32

        # Lane-validity mask: handles the batch tail and the (clamped)
        # duplicate block a core may see when the tile count is odd.
        tile_idx = core * tiles_per_core + j
        start = tile_idx * tile_b
        lane = jax.lax.broadcasted_iota(jnp.int32, (1, tile_b), 1)
        valid = (start + lane) < batch                # (1, tile_b) bool

        pred = jnp.where(valid, pred, 0.0)            # kill garbage tail lanes

        # log-softmax over classes (sublane axis), numerically stable, f32.
        m = jnp.max(pred, axis=0, keepdims=True)      # (1, tile_b)
        z = pred - m
        lse = jnp.log(jnp.sum(jnp.exp(z), axis=0, keepdims=True))
        log_probs = z - lse                           # (C, tile_b)

        # Smooth labels via a C-way VPU select (no MXU, no one-hot tile).
        # Column t of the transposed table is built from scalar constants and
        # a sublane iota (tiny (C,1) ops), then broadcast across the lanes.
        sub = jax.lax.broadcasted_iota(jnp.int32, (C, 1), 0)   # (C, 1)
        smooth = jnp.zeros((C, tile_b), jnp.float32)
        for t in range(C):
            col = jnp.zeros((C, 1), jnp.float32)
            for c in range(C):
                v = float(table_np[t, c])
                if v != 0.0:
                    col = jnp.where(sub == c, jnp.float32(v), col)
            smooth = smooth + jnp.where(tgt == t, col, 0.0)    # (C, tile_b)

        contrib = jnp.where(valid, smooth * log_probs, 0.0)    # (C, tile_b)
        per_lane = jnp.sum(contrib, axis=0, keepdims=True)     # (1, tile_b)
        partial = jnp.sum(per_lane, axis=1, keepdims=True)     # (1, 1)
        acc_ref[...] = acc_ref[...] - partial                  # accumulate -sum

        # Write the per-core partial sum once, as a full lane-dense vreg.
        @pl.when(j == nj - 1)
        def _():
            out_ref[...] = jnp.broadcast_to(acc_ref[...], out_ref.shape)

    return kernel


def label_smoothing_ordinal_loss(predictions, targets,
                                 num_classes: int = NUM_CLASSES,
                                 smoothing: float = SMOOTHING):
    B, C = predictions.shape
    assert C == num_classes
    table_np = build_smooth_label_table(num_classes, smoothing)

    # Lane-dense layout: classes on sublanes, batch on lanes.  No dtype upcast
    # here -- the kernel casts to f32 internally.
    pred_t = predictions.T                                   # (C, B)
    tgt2d = targets.astype(jnp.int32).reshape(1, B)          # (1, B)

    tile_b = B if B <= _MAX_TILE_B else _MAX_TILE_B
    n_blocks = pl.cdiv(B, tile_b)
    tiles_per_core = pl.cdiv(n_blocks, _N_CORES)
    grid = (_N_CORES, tiles_per_core)

    def in_map(core, j):
        # Clamp so an out-of-range logical tile re-reads the last block; its
        # lanes are fully masked out inside the kernel.
        blk = jnp.minimum(core * tiles_per_core + j, n_blocks - 1)
        return (0, blk)

    kernel = _make_kernel(table_np, num_classes, B, tile_b, tiles_per_core)

    out = pl.pallas_call(
        kernel,
        out_shape=jax.ShapeDtypeStruct((_N_CORES * 8, 128), jnp.float32),
        grid_spec=pltpu.PrefetchScalarGridSpec(
            num_scalar_prefetch=0,
            grid=grid,
            in_specs=[
                pl.BlockSpec((num_classes, tile_b), in_map),
                pl.BlockSpec((1, tile_b), in_map),
            ],
            out_specs=pl.BlockSpec((8, 128), lambda core, j: (core, 0)),
            scratch_shapes=[pltpu.VMEM((1, 1), jnp.float32)],
        ),
        compiler_params=pltpu.CompilerParams(
            dimension_semantics=("parallel", "arbitrary")),
    )(pred_t, tgt2d)

    # Sum the per-core partial (negative) sums; apply 1/B exactly once.
    total = sum(out[c * 8, 0] for c in range(_N_CORES))
    return total * (1.0 / B)


def _reference_loss(predictions, targets, num_classes=NUM_CLASSES, smoothing=SMOOTHING):
    table = jnp.asarray(build_smooth_label_table(num_classes, smoothing))
    log_probs = jax.nn.log_softmax(predictions.astype(jnp.float32), axis=1)
    smooth = table[targets]
    return -(smooth * log_probs).sum(axis=1).mean()


if __name__ == "__main__":
    key = jax.random.PRNGKey(0)
    k1, k2 = jax.random.split(key)
    batch = 8
    predictions = jax.random.normal(k1, (batch, NUM_CLASSES), dtype=jnp.float32)
    targets = jax.random.randint(k2, (batch,), 0, NUM_CLASSES, dtype=jnp.int32)

    loss = jax.block_until_ready(label_smoothing_ordinal_loss(predictions, targets))
    ref = jax.block_until_ready(_reference_loss(predictions, targets))
    np.testing.assert_allclose(np.asarray(loss), np.asarray(ref), rtol=1e-5, atol=1e-6)

    print("KERNEL_OK")
</pallas_src>

<mosaic_0001>
module attributes {stable_mosaic.version = 11 : i64} {
  func.func @kernel(%arg0: i32, %arg1: i32, %arg2: memref<5x8xf32, #tpu.memory_space<vmem>>, %arg3: memref<1x8xi32, #tpu.memory_space<vmem>>, %arg4: memref<8x128xf32, #tpu.memory_space<vmem>>, %arg5: memref<1x1xf32, #tpu.memory_space<vmem>>) attributes {dimension_semantics = [#tpu.dimension_semantics<parallel>, #tpu.dimension_semantics<arbitrary>], iteration_bounds = array<i64: 2, 1>, scalar_prefetch = 0 : i64, scratch_operands = 1 : i64, tpu.core_type = #tpu.core_type<tc>, window_params = [{transform_indices = @transform_0, window_bounds = array<i64: 5, 8>}, {transform_indices = @transform_1, window_bounds = array<i64: 1, 8>}, {transform_indices = @transform_2, window_bounds = array<i64: 8, 128>}]} {
    %c0_i32 = arith.constant 0 : i32
    %0 = arith.cmpi eq, %arg1, %c0_i32 : i32
    %1 = arith.extui %0 : i1 to i32
    %c0_i32_0 = arith.constant 0 : i32
    %2 = arith.cmpi ne, %1, %c0_i32_0 : i32
    scf.if %2 {
      %cst_75 = arith.constant 0.000000e+00 : f32
      %186 = vector.broadcast %cst_75 : f32 to vector<1x1xf32>
      %c0_76 = arith.constant 0 : index
      %c0_77 = arith.constant 0 : index
      %187 = vector.load %arg5[%c0_76, %c0_77] : memref<1x1xf32, #tpu.memory_space<vmem>>, vector<1x1xf32>
      tpu.vector_store %arg5[%c0_76, %c0_77], %186 {strides = array<i32>} : memref<1x1xf32, #tpu.memory_space<vmem>>, vector<1x1xf32>,
    } else {
    }
    %c0 = arith.constant 0 : index
    %c0_1 = arith.constant 0 : index
    %3 = vector.load %arg2[%c0, %c0_1] : memref<5x8xf32, #tpu.memory_space<vmem>>, vector<5x8xf32>
    %c0_2 = arith.constant 0 : index
    %c0_3 = arith.constant 0 : index
    %4 = vector.load %arg3[%c0_2, %c0_3] : memref<1x8xi32, #tpu.memory_space<vmem>>, vector<1x8xi32>
    %c1_i32 = arith.constant 1 : i32
    %5 = arith.muli %arg0, %c1_i32 : i32
    %6 = arith.addi %5, %arg1 : i32
    %c8_i32 = arith.constant 8 : i32
    %7 = arith.muli %6, %c8_i32 : i32
    %8 = tpu.iota {dimensions = array<i32: 1>} : vector<1x8xi32>
    %9 = vector.broadcast %7 : i32 to vector<1x8xi32>
    %10 = arith.addi %9, %8 : vector<1x8xi32>
    %c8_i32_4 = arith.constant 8 : i32
    %11 = vector.broadcast %c8_i32_4 : i32 to vector<1x8xi32>
    %12 = arith.cmpi slt, %10, %11 : vector<1x8xi32>
    %cst = arith.constant 0.000000e+00 : f32
    %13 = vector.shape_cast %12 : vector<1x8xi1> to vector<1x8xi1>
    %14 = vector.broadcast %13 : vector<1x8xi1> to vector<5x8xi1>
    %15 = vector.broadcast %cst : f32 to vector<5x8xf32>
    %16 = arith.select %14, %3, %15 : vector<5x8xi1>, vector<5x8xf32>
    %cst_5 = arith.constant dense<0xFF800000> : vector<8xf32>
    %17 = vector.multi_reduction <maximumf>, %16, %cst_5 [0] : vector<5x8xf32> to vector<8xf32>
    %18 = vector.shape_cast %17 : vector<8xf32> to vector<1x8xf32>
    %19 = vector.broadcast %18 : vector<1x8xf32> to vector<5x8xf32>
    %20 = arith.subf %16, %19 : vector<5x8xf32>
    %21 = math.exp %20 : vector<5x8xf32>
    %cst_6 = arith.constant dense<0.000000e+00> : vector<8xf32>
    %22 = vector.multi_reduction <add>, %21, %cst_6 [0] : vector<5x8xf32> to vector<8xf32>
    %23 = vector.shape_cast %22 : vector<8xf32> to vector<1x8xf32>
    %24 = math.log %23 : vector<1x8xf32>
    %25 = vector.broadcast %24 : vector<1x8xf32> to vector<5x8xf32>
    %26 = arith.subf %20, %25 : vector<5x8xf32>
    %27 = tpu.iota {dimensions = array<i32: 0>} : vector<5x1xi32>
    %cst_7 = arith.constant 0.000000e+00 : f32
    %28 = vector.broadcast %cst_7 : f32 to vector<5x8xf32>
    %cst_8 = arith.constant 0.000000e+00 : f32
    %29 = vector.broadcast %cst_8 : f32 to vector<5x1xf32>
    %c0_i32_9 = arith.constant 0 : i32
    %30 = vector.broadcast %c0_i32_9 : i32 to vector<5x1xi32>
    %31 = arith.cmpi eq, %27, %30 : vector<5x1xi32>
    %cst_10 = arith.constant 0.899999976 : f32
    %32 = vector.broadcast %cst_10 : f32 to vector<5x1xf32>
    %33 = arith.select %31, %32, %29 : vector<5x1xi1>, vector<5x1xf32>
    %c1_i32_11 = arith.constant 1 : i32
    %34 = vector.broadcast %c1_i32_11 : i32 to vector<5x1xi32>
    %35 = arith.cmpi eq, %27, %34 : vector<5x1xi32>
    %cst_12 = arith.constant 3.500000e-02 : f32
    %36 = vector.broadcast %cst_12 : f32 to vector<5x1xf32>
    %37 = arith.select %35, %36, %33 : vector<5x1xi1>, vector<5x1xf32>
    %c2_i32 = arith.constant 2 : i32
    %38 = vector.broadcast %c2_i32 : i32 to vector<5x1xi32>
    %39 = arith.cmpi eq, %27, %38 : vector<5x1xi32>
    %cst_13 = arith.constant 1.300000e-02 : f32
    %40 = vector.broadcast %cst_13 : f32 to vector<5x1xf32>
    %41 = arith.select %39, %40, %37 : vector<5x1xi1>, vector<5x1xf32>
    %c3_i32 = arith.constant 3 : i32
    %42 = vector.broadcast %c3_i32 : i32 to vector<5x1xi32>
    %43 = arith.cmpi eq, %27, %42 : vector<5x1xi32>
    %cst_14 = arith.constant 2.600000e-03 : f32
    %44 = vector.broadcast %cst_14 : f32 to vector<5x1xf32>
    %45 = arith.select %43, %44, %41 : vector<5x1xi1>, vector<5x1xf32>
    %c0_i32_15 = arith.constant 0 : i32
    %46 = vector.broadcast %c0_i32_15 : i32 to vector<1x8xi32>
    %47 = arith.cmpi eq, %4, %46 : vector<1x8xi32>
    %cst_16 = arith.constant 0.000000e+00 : f32
    %48 = vector.shape_cast %47 : vector<1x8xi1> to vector<1x8xi1>
    %49 = vector.broadcast %48 : vector<1x8xi1> to vector<5x8xi1>
    %50 = vector.shape_cast %45 : vector<5x1xf32> to vector<5x1xf32>
    %51 = vector.broadcast %50 : vector<5x1xf32> to vector<5x8xf32>
    %52 = vector.broadcast %cst_16 : f32 to vector<5x8xf32>
    %53 = arith.select %49, %51, %52 : vector<5x8xi1>, vector<5x8xf32>
    %54 = arith.addf %28, %53 : vector<5x8xf32>
    %cst_17 = arith.constant 0.000000e+00 : f32
    %55 = vector.broadcast %cst_17 : f32 to vector<5x1xf32>
    %c0_i32_18 = arith.constant 0 : i32
    %56 = vector.broadcast %c0_i32_18 : i32 to vector<5x1xi32>
    %57 = arith.cmpi eq, %27, %56 : vector<5x1xi32>
    %cst_19 = arith.constant 3.500000e-02 : f32
    %58 = vector.broadcast %cst_19 : f32 to vector<5x1xf32>
    %59 = arith.select %57, %58, %55 : vector<5x1xi1>, vector<5x1xf32>
    %c1_i32_20 = arith.constant 1 : i32
    %60 = vector.broadcast %c1_i32_20 : i32 to vector<5x1xi32>
    %61 = arith.cmpi eq, %27, %60 : vector<5x1xi32>
    %cst_21 = arith.constant 0.899999976 : f32
    %62 = vector.broadcast %cst_21 : f32 to vector<5x1xf32>
    %63 = arith.select %61, %62, %59 : vector<5x1xi1>, vector<5x1xf32>
    %c2_i32_22 = arith.constant 2 : i32
    %64 = vector.broadcast %c2_i32_22 : i32 to vector<5x1xi32>
    %65 = arith.cmpi eq, %27, %64 : vector<5x1xi32>
    %cst_23 = arith.constant 2.275000e-02 : f32
    %66 = vector.broadcast %cst_23 : f32 to vector<5x1xf32>
    %67 = arith.select %65, %66, %63 : vector<5x1xi1>, vector<5x1xf32>
    %c3_i32_24 = arith.constant 3 : i32
    %68 = vector.broadcast %c3_i32_24 : i32 to vector<5x1xi32>
    %69 = arith.cmpi eq, %27, %68 : vector<5x1xi32>
    %cst_25 = arith.constant 0.00844999961 : f32
    %70 = vector.broadcast %cst_25 : f32 to vector<5x1xf32>
    %71 = arith.select %69, %70, %67 : vector<5x1xi1>, vector<5x1xf32>
    %c4_i32 = arith.constant 4 : i32
    %72 = vector.broadcast %c4_i32 : i32 to vector<5x1xi32>
    %73 = arith.cmpi eq, %27, %72 : vector<5x1xi32>
    %cst_26 = arith.constant 1.690000e-03 : f32
    %74 = vector.broadcast %cst_26 : f32 to vector<5x1xf32>
    %75 = arith.select %73, %74, %71 : vector<5x1xi1>, vector<5x1xf32>
    %c1_i32_27 = arith.constant 1 : i32
    %76 = vector.broadcast %c1_i32_27 : i32 to vector<1x8xi32>
    %77 = arith.cmpi eq, %4, %76 : vector<1x8xi32>
    %cst_28 = arith.constant 0.000000e+00 : f32
    %78 = vector.shape_cast %77 : vector<1x8xi1> to vector<1x8xi1>
    %79 = vector.broadcast %78 : vector<1x8xi1> to vector<5x8xi1>
    %80 = vector.shape_cast %75 : vector<5x1xf32> to vector<5x1xf32>
    %81 = vector.broadcast %80 : vector<5x1xf32> to vector<5x8xf32>
    %82 = vector.broadcast %cst_28 : f32 to vector<5x8xf32>
    %83 = arith.select %79, %81, %82 : vector<5x8xi1>, vector<5x8xf32>
    %84 = arith.addf %54, %83 : vector<5x8xf32>
    %cst_29 = arith.constant 0.000000e+00 : f32
    %85 = vector.broadcast %cst_29 : f32 to vector<5x1xf32>
    %c0_i32_30 = arith.constant 0 : i32
    %86 = vector.broadcast %c0_i32_30 : i32 to vector<5x1xi32>
    %87 = arith.cmpi eq, %27, %86 : vector<5x1xi32>
    %cst_31 = arith.constant 0.00844999961 : f32
    %88 = vector.broadcast %cst_31 : f32 to vector<5x1xf32>
    %89 = arith.select %87, %88, %85 : vector<5x1xi1>, vector<5x1xf32>
    %c1_i32_32 = arith.constant 1 : i32
    %90 = vector.broadcast %c1_i32_32 : i32 to vector<5x1xi32>
    %91 = arith.cmpi eq, %27, %90 : vector<5x1xi32>
    %cst_33 = arith.constant 3.500000e-02 : f32
    %92 = vector.broadcast %cst_33 : f32 to vector<5x1xf32>
    %93 = arith.select %91, %92, %89 : vector<5x1xi1>, vector<5x1xf32>
    %c2_i32_34 = arith.constant 2 : i32
    %94 = vector.broadcast %c2_i32_34 : i32 to vector<5x1xi32>
    %95 = arith.cmpi eq, %27, %94 : vector<5x1xi32>
    %cst_35 = arith.constant 0.899999976 : f32
    %96 = vector.broadcast %cst_35 : f32 to vector<5x1xf32>
    %97 = arith.select %95, %96, %93 : vector<5x1xi1>, vector<5x1xf32>
    %c3_i32_36 = arith.constant 3 : i32
    %98 = vector.broadcast %c3_i32_36 : i32 to vector<5x1xi32>
    %99 = arith.cmpi eq, %27, %98 : vector<5x1xi32>
    %cst_37 = arith.constant 2.275000e-02 : f32
    %100 = vector.broadcast %cst_37 : f32 to vector<5x1xf32>
    %101 = arith.select %99, %100, %97 : vector<5x1xi1>, vector<5x1xf32>
    %c4_i32_38 = arith.constant 4 : i32
    %102 = vector.broadcast %c4_i32_38 : i32 to vector<5x1xi32>
    %103 = arith.cmpi eq, %27, %102 : vector<5x1xi32>
    %cst_39 = arith.constant 6.760000e-03 : f32
    %104 = vector.broadcast %cst_39 : f32 to vector<5x1xf32>
    %105 = arith.select %103, %104, %101 : vector<5x1xi1>, vector<5x1xf32>
    %c2_i32_40 = arith.constant 2 : i32
    %106 = vector.broadcast %c2_i32_40 : i32 to vector<1x8xi32>
    %107 = arith.cmpi eq, %4, %106 : vector<1x8xi32>
    %cst_41 = arith.constant 0.000000e+00 : f32
    %108 = vector.shape_cast %107 : vector<1x8xi1> to vector<1x8xi1>
    %109 = vector.broadcast %108 : vector<1x8xi1> to vector<5x8xi1>
    %110 = vector.shape_cast %105 : vector<5x1xf32> to vector<5x1xf32>
    %111 = vector.broadcast %110 : vector<5x1xf32> to vector<5x8xf32>
    %112 = vector.broadcast %cst_41 : f32 to vector<5x8xf32>
    %113 = arith.select %109, %111, %112 : vector<5x8xi1>, vector<5x8xf32>
    %114 = arith.addf %84, %113 : vector<5x8xf32>
    %cst_42 = arith.constant 0.000000e+00 : f32
    %115 = vector.broadcast %cst_42 : f32 to vector<5x1xf32>
    %c0_i32_43 = arith.constant 0 : i32
    %116 = vector.broadcast %c0_i32_43 : i32 to vector<5x1xi32>
    %117 = arith.cmpi eq, %27, %116 : vector<5x1xi32>
    %cst_44 = arith.constant 1.690000e-03 : f32
    %118 = vector.broadcast %cst_44 : f32 to vector<5x1xf32>
    %119 = arith.select %117, %118, %115 : vector<5x1xi1>, vector<5x1xf32>
    %c1_i32_45 = arith.constant 1 : i32
    %120 = vector.broadcast %c1_i32_45 : i32 to vector<5x1xi32>
    %121 = arith.cmpi eq, %27, %120 : vector<5x1xi32>
    %cst_46 = arith.constant 0.00844999961 : f32
    %122 = vector.broadcast %cst_46 : f32 to vector<5x1xf32>
    %123 = arith.select %121, %122, %119 : vector<5x1xi1>, vector<5x1xf32>
    %c2_i32_47 = arith.constant 2 : i32
    %124 = vector.broadcast %c2_i32_47 : i32 to vector<5x1xi32>
    %125 = arith.cmpi eq, %27, %124 : vector<5x1xi32>
    %cst_48 = arith.constant 3.500000e-02 : f32
    %126 = vector.broadcast %cst_48 : f32 to vector<5x1xf32>
    %127 = arith.select %125, %126, %123 : vector<5x1xi1>, vector<5x1xf32>
    %c3_i32_49 = arith.constant 3 : i32
    %128 = vector.broadcast %c3_i32_49 : i32 to vector<5x1xi32>
    %129 = arith.cmpi eq, %27, %128 : vector<5x1xi32>
    %cst_50 = arith.constant 0.899999976 : f32
    %130 = vector.broadcast %cst_50 : f32 to vector<5x1xf32>
    %131 = arith.select %129, %130, %127 : vector<5x1xi1>, vector<5x1xf32>
    %c4_i32_51 = arith.constant 4 : i32
    %132 = vector.broadcast %c4_i32_51 : i32 to vector<5x1xi32>
    %133 = arith.cmpi eq, %27, %132 : vector<5x1xi32>
    %cst_52 = arith.constant 2.275000e-02 : f32
    %134 = vector.broadcast %cst_52 : f32 to vector<5x1xf32>
    %135 = arith.select %133, %134, %131 : vector<5x1xi1>, vector<5x1xf32>
    %c3_i32_53 = arith.constant 3 : i32
    %136 = vector.broadcast %c3_i32_53 : i32 to vector<1x8xi32>
    %137 = arith.cmpi eq, %4, %136 : vector<1x8xi32>
    %cst_54 = arith.constant 0.000000e+00 : f32
    %138 = vector.shape_cast %137 : vector<1x8xi1> to vector<1x8xi1>
    %139 = vector.broadcast %138 : vector<1x8xi1> to vector<5x8xi1>
    %140 = vector.shape_cast %135 : vector<5x1xf32> to vector<5x1xf32>
    %141 = vector.broadcast %140 : vector<5x1xf32> to vector<5x8xf32>
    %142 = vector.broadcast %cst_54 : f32 to vector<5x8xf32>
    %143 = arith.select %139, %141, %142 : vector<5x8xi1>, vector<5x8xf32>
    %144 = arith.addf %114, %143 : vector<5x8xf32>
    %cst_55 = arith.constant 0.000000e+00 : f32
    %145 = vector.broadcast %cst_55 : f32 to vector<5x1xf32>
    %c1_i32_56 = arith.constant 1 : i32
    %146 = vector.broadcast %c1_i32_56 : i32 to vector<5x1xi32>
    %147 = arith.cmpi eq, %27, %146 : vector<5x1xi32>
    %cst_57 = arith.constant 2.600000e-03 : f32
    %148 = vector.broadcast %cst_57 : f32 to vector<5x1xf32>
    %149 = arith.select %147, %148, %145 : vector<5x1xi1>, vector<5x1xf32>
    %c2_i32_58 = arith.constant 2 : i32
    %150 = vector.broadcast %c2_i32_58 : i32 to vector<5x1xi32>
    %151 = arith.cmpi eq, %27, %150 : vector<5x1xi32>
    %cst_59 = arith.constant 1.300000e-02 : f32
    %152 = vector.broadcast %cst_59 : f32 to vector<5x1xf32>
    %153 = arith.select %151, %152, %149 : vector<5x1xi1>, vector<5x1xf32>
    %c3_i32_60 = arith.constant 3 : i32
    %154 = vector.broadcast %c3_i32_60 : i32 to vector<5x1xi32>
    %155 = arith.cmpi eq, %27, %154 : vector<5x1xi32>
    %cst_61 = arith.constant 3.500000e-02 : f32
    %156 = vector.broadcast %cst_61 : f32 to vector<5x1xf32>
    %157 = arith.select %155, %156, %153 : vector<5x1xi1>, vector<5x1xf32>
    %c4_i32_62 = arith.constant 4 : i32
    %158 = vector.broadcast %c4_i32_62 : i32 to vector<5x1xi32>
    %159 = arith.cmpi eq, %27, %158 : vector<5x1xi32>
    %cst_63 = arith.constant 0.899999976 : f32
    %160 = vector.broadcast %cst_63 : f32 to vector<5x1xf32>
    %161 = arith.select %159, %160, %157 : vector<5x1xi1>, vector<5x1xf32>
    %c4_i32_64 = arith.constant 4 : i32
    %162 = vector.broadcast %c4_i32_64 : i32 to vector<1x8xi32>
    %163 = arith.cmpi eq, %4, %162 : vector<1x8xi32>
    %cst_65 = arith.constant 0.000000e+00 : f32
    %164 = vector.shape_cast %163 : vector<1x8xi1> to vector<1x8xi1>
    %165 = vector.broadcast %164 : vector<1x8xi1> to vector<5x8xi1>
    %166 = vector.shape_cast %161 : vector<5x1xf32> to vector<5x1xf32>
    %167 = vector.broadcast %166 : vector<5x1xf32> to vector<5x8xf32>
    %168 = vector.broadcast %cst_65 : f32 to vector<5x8xf32>
    %169 = arith.select %165, %167, %168 : vector<5x8xi1>, vector<5x8xf32>
    %170 = arith.addf %144, %169 : vector<5x8xf32>
    %171 = arith.mulf %170, %26 : vector<5x8xf32>
    %cst_66 = arith.constant 0.000000e+00 : f32
    %172 = vector.shape_cast %12 : vector<1x8xi1> to vector<1x8xi1>
    %173 = vector.broadcast %172 : vector<1x8xi1> to vector<5x8xi1>
    %174 = vector.broadcast %cst_66 : f32 to vector<5x8xf32>
    %175 = arith.select %173, %171, %174 : vector<5x8xi1>, vector<5x8xf32>
    %cst_67 = arith.constant dense<0.000000e+00> : vector<8xf32>
    %176 = vector.multi_reduction <add>, %175, %cst_67 [0] : vector<5x8xf32> to vector<8xf32>
    %177 = vector.shape_cast %176 : vector<8xf32> to vector<1x8xf32>
    %cst_68 = arith.constant dense<0.000000e+00> : vector<1xf32>
    %178 = vector.multi_reduction <add>, %177, %cst_68 [1] : vector<1x8xf32> to vector<1xf32>
    %179 = vector.shape_cast %178 : vector<1xf32> to vector<1x1xf32>
    %c0_69 = arith.constant 0 : index
    %c0_70 = arith.constant 0 : index
    %180 = vector.load %arg5[%c0_69, %c0_70] : memref<1x1xf32, #tpu.memory_space<vmem>>, vector<1x1xf32>
    %181 = arith.subf %180, %179 : vector<1x1xf32>
    %c0_71 = arith.constant 0 : index
    %c0_72 = arith.constant 0 : index
    %182 = vector.load %arg5[%c0_71, %c0_72] : memref<1x1xf32, #tpu.memory_space<vmem>>, vector<1x1xf32>
    tpu.vector_store %arg5[%c0_71, %c0_72], %181 {strides = array<i32>} : memref<1x1xf32, #tpu.memory_space<vmem>>, vector<1x1xf32>,
    %c0_i32_73 = arith.constant 0 : i32
    %183 = arith.cmpi eq, %arg1, %c0_i32_73 : i32
    %184 = arith.extui %183 : i1 to i32
    %c0_i32_74 = arith.constant 0 : i32
    %185 = arith.cmpi ne, %184, %c0_i32_74 : i32
    scf.if %185 {
      %c0_75 = arith.constant 0 : index
      %c0_76 = arith.constant 0 : index
      %186 = vector.load %arg5[%c0_75, %c0_76] : memref<1x1xf32, #tpu.memory_space<vmem>>, vector<1x1xf32>
      %187 = vector.shape_cast %186 : vector<1x1xf32> to vector<1x1xf32>
      %188 = vector.broadcast %187 : vector<1x1xf32> to vector<8x128xf32>
      %c0_77 = arith.constant 0 : index
      %c0_78 = arith.constant 0 : index
      %189 = vector.load %arg4[%c0_77, %c0_78] : memref<8x128xf32, #tpu.memory_space<vmem>>, vector<8x128xf32>
      tpu.vector_store %arg4[%c0_77, %c0_78], %188 {strides = array<i32>} : memref<8x128xf32, #tpu.memory_space<vmem>>, vector<8x128xf32>,
    } else {
    }
    return
  }
  func.func @transform_0(%arg0: i32, %arg1: i32) -> (i32, i32) {
    %c1_i32 = arith.constant 1 : i32
    %0 = arith.muli %arg0, %c1_i32 : i32
    %1 = arith.addi %0, %arg1 : i32
    %c0_i32 = arith.constant 0 : i32
    %2 = arith.minsi %1, %c0_i32 : i32
    %c0_i32_0 = arith.constant 0 : i32
    %c0_i32_1 = arith.constant 0 : i32
    return %c0_i32_0, %2 : i32, i32
  }
  func.func @transform_1(%arg0: i32, %arg1: i32) -> (i32, i32) {
    %c1_i32 = arith.constant 1 : i32
    %0 = arith.muli %arg0, %c1_i32 : i32
    %1 = arith.addi %0, %arg1 : i32
    %c0_i32 = arith.constant 0 : i32
    %2 = arith.minsi %1, %c0_i32 : i32
    %c0_i32_0 = arith.constant 0 : i32
    %c0_i32_1 = arith.constant 0 : i32
    return %c0_i32_0, %2 : i32, i32
  }
  func.func @transform_2(%arg0: i32, %arg1: i32) -> (i32, i32) {
    %c0_i32 = arith.constant 0 : i32
    %c0_i32_0 = arith.constant 0 : i32
    return %arg0, %c0_i32 : i32, i32
  }
}

</mosaic_0001>

<bundles_post_ra>
// kernel: tpu_custom_call.1
= control target key start
LH: loop header
LB: loop body
LE: loop exit
PB: predicated region body
PF: predicated region fallthrough
CT: control target
= control target key end

     0   :  { %7 = vsyncpa [#allocation4], 0  ;;  %s1038_s0 = inlined_call_operand.hbm [shape: f32[5,8], index: 0, kind: input, shape index: {}]   ;;  %s1039_s1 = inlined_call_operand.hbm [shape: s32[1,8], index: 1, kind: input, shape index: {}]   ;;  %s1040_s2 = inlined_call_operand.hbm [shape: f32[16,128], index: 2, kind: output, shape index: {}]  }
   0x1   :  { %9 = vsyncpa [#allocation4 + $0x1], 0 }
   0x2   :  { %10 = vsyncpa [#allocation7], 0 }
   0x3   :  { %12 = vsyncpa [#allocation7 + $0x1], 0 }
   0x4   :  { %13 = vsyncpa [#allocation5], 0 }
   0x5   :  { %15 = vsyncpa [#allocation5 + $0x1], 0  ;;  %s773_s9 = smov 0   ;;  %s775_s10 = smov 0  }
   0x6   :  { %s777_s11 = smov 0   ;;  %s779_s12 = smov 0  }
   0x7   :  { %s781_s13 = smov 0   ;;  %s783_s14 = smov 0  }
   0x8   :  { %s785_s15 = smov 0   ;;  %s787_s16 = smov 0  }
   0x9 LB: > { %s472_s17 = sadd.s32 4294967295, %s752_s16   ;;  %s473_s18 = sadd.s32 4294967294, %s752_s16   ;;  %s752_s16 = sphi %s787_s16, %s21_s16   ;;  %s748_s15 = sphi %s785_s15, %s1058_s15   ;;  %s744_s14 = sphi %s783_s14, %s1057_s14   ;;  %s740_s13 = sphi %s781_s13, %s1028_s13   ;;  %s736_s12 = sphi %s779_s12, %s1056_s12   ;;  %s732_s11 = sphi %s777_s11, %s1055_s11   ;;  %s728_s10 = sphi %s775_s10, %s1054_s10   ;;  %s724_s9 = sphi %s773_s9, %s1053_s9  }
   0xa   : > { %s33_s19 = sadd.s32 1, %s748_s15  ;;  %p721_p1 = scmp.ne.s32.totalorder %s740_s13, 0 }
   0xb   : > { %p35_p0 = scmp.ge.s32.totalorder %s33_s19, 2  ;;  %p54_p2 = scmp.eq.s32.totalorder %s752_s16, 0 }
   0xc   : > { %p59_p3 = scmp.ne.s32.totalorder %s740_s13, %s736_s12  ;;  %p60_p5 = scmp.eq.s32.totalorder %s472_s17, 0 }
   0xd   : > { %s1060_s19 = smov (%p35_p0, %s33_s19), 0  ;;  %p819_p4 = por %p721_p1, %p54_p2 }
   0xe   : > { %p823_p6 = por %p60_p5, %p59_p3  ;;  %s101_s22 = ssub.s32 %s748_s15, %s1060_s19 }
   0xf   : > { %p102_p7 = scmp.eq.s32.totalorder %s101_s22, 0  ;;  %s104_s23 = sadd.s32 1, %s732_s11 }
  0x10   : > { %p114_p8 = scmp.ne.s32.totalorder %s732_s11, %s728_s10  ;;  %p115_p9 = scmp.eq.s32.totalorder %s472_s17, 1 }
  0x11   : > { %s831_s24 = scalar_select %p102_p7, %s732_s11, %s104_s23  }
  0x12   : > { %p120_p10 = scmp.ne.s32.totalorder %s728_s10, %s724_s9  ;;  %p121_p11 = scmp.eq.s32.totalorder %s473_s18, 1 }
  0x13   : > { %p837_p12 = por %p115_p9, %p114_p8  ;;  %p475_p13 = scmp.ge.s32.totalorder %s752_s16, 2 }
  0x14   : > { %p842_p0 = por %p121_p11, %p120_p10  ;;  %p503_p1 = scmp.lt.s32.totalorder %s752_s16, 2 }
  0x15   : > { %s154_s29 = sshll.u32 %s1038_s0, 4  ;;  %s754_s30 = smov [#allocation3]   ;;  %s155_s29 = int_to_ptr.hbm [resolvable:$true] %s154_s29 }
  0x16   : > { %s156_s3 = sshll.u32 %s754_s30, 4  ;;  %p852_p2 = pnand %p503_p1, %p819_p4  ;;  %s157_s3 = int_to_ptr.vmem [resolvable:$true] %s156_s3 }
  0x17   : > { %p478_p3 = scmp.ge.s32.totalorder %s752_s16, 1  ;;  %p181_p5 = scmp.lt.s32.totalorder %s752_s16, 3 }
  0x18   : > { %s585_s5 = sshra.s32 %s155_s29, 4  ;;  %p589_p8 = pneg %p852_p2  ;;  %s586_s5 = int_to_ptr.hbm [resolvable:$true] %s585_s5 }
  0x19   : > { %s587_s6 = scalar_lea.hbm %s586_s5, 8  ;;  %s592_s12 = scalar_lea.hbm %s1038_s0, 8 }
  0x1a   : > { %p588_p7 = scmp.ne.s32.totalorder %s586_s5, %s587_s6  ;;  %p594_p4 = scmp.lt.s32.totalorder %s592_s12, %s587_s6 }
  0x1c   : > { %p590_p9 = pnand %p589_p8, %p588_p7 }
  0x1e   : > { %p591_p10 = pneg %p590_p9 }
  0x20   : > { %p596_p11 = pnand %p594_p4, %p591_p10 }
  0x22   : > { %599 = shalt.err (!%p596_p11)
}
  0x23   : > { %495 = dma.hbm_to_vmem [thread:$0]  (!%p852_p2), %s155_s29, 128, %s157_s3, [#allocation4]  }
  0x24   : > { %p872_p1 = pnand %p478_p3, %p181_p5  ;;  %s174_s22 = sshll.u32 %s1039_s1, 4  ;;  %s175_s22 = int_to_ptr.hbm [resolvable:$true] %s174_s22 }
  0x25   : > { %s755_s23 = smov [#allocation6]   ;;  %s615_s28 = sshra.s32 %s175_s22, 4  ;;  %s616_s28 = int_to_ptr.hbm [resolvable:$true] %s615_s28 }
  0x26   : > { %s176_s27 = sshll.u32 %s755_s23, 4  ;;  %s617_s30 = scalar_lea.hbm %s616_s28, 1  ;;  %s177_s27 = int_to_ptr.vmem [resolvable:$true] %s176_s27 }
  0x27   : > { %p618_p7 = scmp.ne.s32.totalorder %s616_s28, %s617_s30  ;;  %s622_s5 = scalar_lea.hbm %s1039_s1, 1 }
  0x28   : > { %p624_p3 = scmp.lt.s32.totalorder %s622_s5, %s617_s30 }
  0x29   : > { %p620_p9 = pnand %p618_p7, %p589_p8 }
  0x2b   : > { %p621_p10 = pneg %p620_p9 }
  0x2d   : > { %p626_p5 = pnand %p624_p3, %p621_p10 }
  0x2f   : > { %629 = shalt.err (!%p626_p5)
}
  0x30   : > { %498 = dma.hbm_to_vmem [thread:$0]  (!%p852_p2), %s175_s22, 16, %s177_s27, [#allocation7]  }
  0x31   : > { %185 = sbr.rel (%p872_p1) target bundleno = 374 (0x176), region = 28  ;;  %s890_s6 = sand.u32 (!%p872_p1), 1, %s740_s13  }
  0x32   : > { %s479_s7 = sshll.u32 (!%p872_p1), %s890_s6, 3  ;;  %s188_s8 = scalar_lea.sflag (!%p872_p1), [#allocation4], %s890_s6 }
  0x33   : > { %s191_s12 = scalar_lea.vmem (!%p872_p1), [#allocation3], %s479_s7 }
  0x36   : > { %710 = dma.done.wait (%p823_p6), %s188_s8, 128  }
  0x37   : > { %712 = vsyncadd (%p823_p6), %s188_s8, 4294967168  ;;  %s198_s4 = scalar_lea.sflag [#allocation7], %s890_s6  ;;  %s200_s17 = scalar_lea.vmem [#allocation6], %s890_s6 }
  0x38   : > { %714 = dma.done.wait (%p823_p6), %s198_s4, 16  }
  0x39   : > { %716 = vsyncadd (%p823_p6), %s198_s4, 4294967280  ;;  %s481_s18 = sshll.u32 %s744_s14, 3  ;;  %v242_v0 = vlaneseq  ;;  %vm250_vm1 = vcmask 61440   ;;  %v238_v4 = vld [vmem:[%s191_s12] sm:$0x1f]  ;;  %v756_v9 = vmov 0  }
  0x3a   : > { %v244_v1 = vstv %s481_s18  ;;  %579 = vset.pattern.permute.xlu0 %v756_v9  ;;  %v239_v15 = vld [vmem:[%s200_s17] sm:$0x1]  ;;  %v757_v17 = vmov 0.0   ;;  %vm236_vm15 = vcmask 0   ;;  %s223_s21 = sand.u32 1, %s728_s10   ;;  %s370_s27 = scalar_lea.hbm %s1040_s2, %s481_s18 }
  0x3b   : > { %v243_v2 = vand.u32 127, %v242_v0  ;;  %v913_v12 = vshrl.u32 %v242_v0, 7  ;;  %vm281_vm4 = vcmp.eq.s32.totalorder %v239_v15, 0  ;;  %vm293_vm5 = vcmp.eq.s32.totalorder %v239_v15, 1  ;;  %237 = vst.msk [vmem:[#allocation2] sm:$0x1] %vm236_vm15, %v757_v17 }
  0x3c   : > { %v282_v24 = vsel %vm281_vm4, 1, %v756_v9  ;;  %v294_v25 = vsel %vm293_vm5, 1, %v756_v9  ;;  %vm304_vm8 = vcmp.eq.s32.totalorder %v239_v15, 2  ;;  %vm315_vm10 = vcmp.eq.s32.totalorder %v239_v15, 3  ;;  %s480_s20 = sshll.u32 %s223_s21, 3  ;;  %s374_s29 = sshll.u32 %s370_s27, 4  ;;  %s375_s29 = int_to_ptr.hbm [resolvable:$true] %s374_s29 }
  0x3d   : > { %v907_v3 = vadd.s32 %v244_v1, %v243_v2  ;;  %vm273_vm2 = vcmp.eq.s32.totalorder %v913_v12, 0  ;;  %vm275_vm3 = vcmp.eq.s32.totalorder %v913_v12, 1  ;;  %vm277_vm6 = vcmp.eq.s32.totalorder %v913_v12, 2  ;;  %s225_s28 = scalar_lea.vmem [#allocation8], %s480_s20  ;;  %s360_s3 = scalar_lea.sflag [#allocation5], %s223_s21 }
  0x3e   : > { %v287_v18 = vsel %vm273_vm2, 0.035, %v757_v17  ;;  %v274_v20 = vsel %vm273_vm2, 0.9, %v757_v17  ;;  %v299_v22 = vsel %vm273_vm2, 0.00845, %v757_v17 }
  0x3f   : > { %vm246_vm0 = vcmp.lt.s32.totalorder %v907_v3, 8  ;;  %v288_v21 = vsel %vm275_vm3, 0.9, %v287_v18  ;;  %v276_v23 = vsel %vm275_vm3, 0.035, %v274_v20  ;;  %vm279_vm7 = vcmp.eq.s32.totalorder %v913_v12, 3 }
  0x40   : > { %v249_v5 = vsel %vm246_vm0, %v238_v4, 0.0  ;;  %v289_v26 = vsel %vm277_vm6, 0.02275, %v288_v21  ;;  %v300_v27 = vsel %vm275_vm3, 0.035, %v299_v22  ;;  %v283_v29 = vperm.slane %v282_v24, 0 }
  0x41   : > { %v251_v6 = vsel %vm250_vm1, %v249_v5, -inf  ;;  %v278_v28 = vsel %vm277_vm6, 0.013, %v276_v23  ;;  %v295_v30 = vperm.slane %v294_v25, 0  ;;  %v310_v31 = vsel %vm273_vm2, 0.00169, %v757_v17 }
  0x42   : > { %v252_v7 = vrot.slane %v251_v6, 4  ;;  %v290_v33 = vsel %vm279_vm7, 0.00845, %v289_v26  ;;  %vm291_vm9 = vcmp.eq.s32.totalorder %v913_v12, 4  ;;  %v305_v34 = vsel %vm304_vm8, 1, %v756_v9  ;;  %s372_s30 = sshll.u32 %s225_s28, 4  ;;  %s373_s30 = int_to_ptr.vmem [resolvable:$true] %s372_s30 }
  0x43   : > { %v301_v36 = vsel %vm277_vm6, 0.9, %v300_v27  ;;  %v280_v38 = vsel %vm279_vm7, 0.0026, %v278_v28  ;;  %v311_v39 = vsel %vm275_vm3, 0.00845, %v310_v31 }
  0x44   : > { %v253_v8 = vmax.f32 %v251_v6, %v252_v7  ;;  %vm950_vm11 = vcmp.eq.s32.totalorder %v283_v29, 1  ;;  %v292_v41 = vsel %vm291_vm9, 0.00169, %v290_v33  ;;  %vm956_vm12 = vcmp.eq.s32.totalorder %v295_v30, 1  ;;  %v344_v23 = vld [vmem:[#allocation2] sm:$0x1] }
  0x45   : > { %v306_v43 = vperm.slane %v305_v34, 0  ;;  %v302_v45 = vsel %vm279_vm7, 0.02275, %v301_v36  ;;  %v316_v46 = vsel %vm315_vm10, 1, %v756_v9  ;;  %v312_v47 = vsel %vm277_vm6, 0.035, %v311_v39 }
  0x46   : > { %v254_v10 = vrot.slane %v253_v8, 2  ;;  %vm325_vm13 = vcmp.eq.s32.totalorder %v239_v15, 4  ;;  %v285_v49 = vsel %vm950_vm11, %v280_v38, 0.0  ;;  %v297_v50 = vsel %vm956_vm12, %v292_v41, 0.0  ;;  %s659_s5 = sshra.s32 %s375_s29, 4  ;;  %s665_s8 = scalar_lea.hbm %s1040_s2, 16  ;;  %s660_s5 = int_to_ptr.hbm [resolvable:$true] %s659_s5 }
  0x47   : > { %v321_v51 = vsel %vm275_vm3, 0.0026, %v757_v17  ;;  %v303_v52 = vsel %vm291_vm9, 0.00676, %v302_v45  ;;  %vm972_vm14 = vcmp.eq.s32.totalorder %v306_v43, 1  ;;  %v317_v54 = vperm.slane %v316_v46, 0  ;;  %p666_p4 = scmp.lt.s32.totalorder %s660_s5, %s1040_s2 }
  0x48   : > { %v255_v11 = vmax.f32 %v253_v8, %v254_v10  ;;  %v313_v56 = vsel %vm279_vm7, 0.9, %v312_v47  ;;  %v326_v57 = vsel %vm325_vm13, 1, %v756_v9  ;;  %v298_v58 = vadd.f32 %v297_v50, %v285_v49  ;;  %s661_s6 = scalar_lea.hbm %s660_s5, 8 }
  0x49   : > { %v322_v59 = vsel %vm277_vm6, 0.013, %v321_v51  ;;  %v308_v61 = vsel %vm972_vm14, %v303_v52, 0.0  ;;  %v314_v62 = vsel %vm291_vm9, 0.02275, %v313_v56  ;;  %vm318_vm2 = vcmp.eq.s32.totalorder %v317_v54, 1  ;;  %p662_p6 = scmp.ne.s32.totalorder %s660_s5, %s661_s6  ;;  %p667_p11 = scmp.lt.s32.totalorder %s665_s8, %s661_s6 }
  0x4a   : > { %v256_v13 = vrot.slane %v255_v11, 1  ;;  %v327_v63 = vperm.slane %v326_v57, 0  ;;  %v323_v1 = vsel %vm279_vm7, 0.035, %v322_v59  ;;  %v309_v2 = vadd.f32 %v308_v61, %v298_v58 }
  0x4b   : > { %v319_v4 = vsel %vm318_vm2, %v314_v62, 0.0  ;;  %vm340_vm4 = vcmask 64512   ;;  %p663_p2 = pnand %p662_p6, %p837_p12  ;;  %p668_p1 = por %p667_p11, %p666_p4 }
  0x4c   : > { %v257_v14 = vmax.f32 %v255_v11, %v256_v13  ;;  %vm328_vm3 = vcmp.eq.s32.totalorder %v327_v63, 1  ;;  %v320_v6 = vadd.f32 %v319_v4, %v309_v2 }
  0x4d   : > { %p664_p8 = pneg %p663_p2 }
  0x4e   : > { %v916_v16 = vsub.f32 %v249_v5, %v257_v14  ;;  %v324_v5 = vsel %vm291_vm9, 0.9, %v323_v1 }
  0x4f   : > { %v329_v7 = vsel %vm328_vm3, %v324_v5, 0.0  ;;  %p669_p7 = pnand %p668_p1, %p664_p8 }
  0x50   : > { %v259_v19 = vmul.f32 1.442695, %v916_v16  ;;  %v330_v10 = vadd.f32 %v329_v7, %v320_v6 }
  0x52   : > { %581 = vpow2.f32 %v259_v19 }
  0x58   : > { %v582_v32 = vpop.eup %581 }
  0x59   : > { %v261_v35 = vsel %vm250_vm1, %v582_v32, 0.0 }
  0x5a   : > { %v262_v37 = vrot.slane %v261_v35, 4 }
  0x5c   : > { %v263_v44 = vadd.f32 %v262_v37, %v261_v35 }
  0x5e   : > { %v264_v48 = vrot.slane %v263_v44, 2 }
  0x60   : > { %v265_v55 = vadd.f32 %v264_v48, %v263_v44 }
  0x62   : > { %v266_v60 = vrot.slane %v265_v55, 1 }
  0x64   : > { %v267_v0 = vadd.f32 %v266_v60, %v265_v55 }
  0x66   : > { %583 = vlog2.f32 %v267_v0 }
  0x6c   : > { %v584_v8 = vpop.eup %583 }
  0x6d   : > { %v269_v9 = vmul.f32 0.6931472, %v584_v8 }
  0x6f   : > { %v270_v11 = vsub.f32 %v916_v16, %v269_v9 }
  0x71   : > { %v331_v13 = vmul.f32 %v330_v10, %v270_v11 }
  0x73   : > { %v332_v14 = vsel %vm246_vm0, %v331_v13, 0.0 }
  0x74   : > { %v333_v15 = vsel %vm250_vm1, %v332_v14, 0.0 }
  0x75   : > { %v334_v17 = vrot.slane %v333_v15, 4 }
  0x77   : > { %v335_v18 = vadd.f32 %v334_v17, %v333_v15 }
  0x79   : > { %v336_v12 = vrot.slane %v335_v18, 2 }
  0x7b   : > { %v337_v19 = vadd.f32 %v336_v12, %v335_v18 }
  0x7d   : > { %v338_v20 = vrot.slane %v337_v19, 1 }
  0x7f   : > { %v339_v21 = vadd.f32 %v338_v20, %v337_v19 }
  0x81   : > { %v341_v22 = vsel %vm340_vm4, %v339_v21, 0.0 }
  0x82   : > { %342 = vadd.xlane.f32.xlu0 %v341_v22 }
  0xf5   : > { %v343_v24 = vpop.xlane.xlu0 %342 }
  0xf6   : > { %v345_v16 = vsub.f32 %v344_v23, %v343_v24 }
  0xf8   : > { %347 = vst.msk [vmem:[#allocation2] sm:$0x1] %vm236_vm15, %v345_v16 }
  0xff   : > { %v580_v3 = vld [vmem:[#allocation2] ss:$0 sm:$0xff] }
 0x100   : > { %355 = vperm.xlu0 %579, %v580_v3  }
 0x172   : > { %v356_v25 = vpop.permute.xlu0 %355 }
 0x173   : > { %358 = vst [vmem:[%s225_s28] sm:$0xff] %v356_v25 }
 0x174   : > { %672 = shalt.err (!%p669_p7)
}
 0x175   : > { %490 = dma.vmem_to_hbm [thread:$0]  (%p837_p12), %s373_s30, 128, %s375_s29, %s360_s3  }
 0x176 PF: > { %s386_s17 = sand.u32 1, %s724_s9   ;;  %p500_p9 = pnand %p475_p13, %p842_p0 }
 0x177   : > { %s387_s18 = scalar_lea.sflag [#allocation5], %s386_s17 }
 0x178   : > { %p501_p10 = pneg %p500_p9 }
 0x17a   : > { %718 = dma.done.wait (%p501_p10), %s387_s18, 128  }
 0x17b   : > { %720 = vsyncadd (%p501_p10), %s387_s18, 4294967168  ;;  %s21_s16 = sadd.s32 1, %s752_s16   ;;  %s1053_s9 = smov %s728_s10 }
 0x17c   : > { %p18_p3 = scmp.ge.s32.totalorder %s21_s16, 4   ;;  %s1054_s10 = smov %s732_s11 }
 0x17d   : > { %s1055_s11 = smov %s831_s24  ;;  %s1056_s12 = smov %s740_s13 }
 0x17e   : > { %s1028_s13 = smov 0   ;;  %s1057_s14 = smov %s748_s15 }
 0x17f   : > { %s1058_s15 = smov %s1060_s19  ;;  %20 = sbr.rel (!%p18_p3) target bundleno = 9 (0x9), region = 94 }
 0x184   :  { %393 = vsyncpa [#allocation4], 1 }
 0x185   :  { %395 = vsyncpa [#allocation4 + $0x1], 1 }
 0x186   :  { %396 = vsyncpa [#allocation7], 1 }
 0x187   :  { %398 = vsyncpa [#allocation7 + $0x1], 1 }
 0x188   :  { %399 = vsyncpa [#allocation5], 1 }
 0x189   :  { %401 = vsyncpa [#allocation5 + $0x1], 1 }

</bundles_post_ra>
